<compile_context>
chip_gen: v6e
topology: v6e:2x2x1
jax: 0.10.0
libtpu: 0.0.40
codegen_flags: <defaults>
</compile_context>

<pallas_src>
import functools
import math

import jax
import jax.numpy as jnp
from jax.experimental import pallas as pl
from jax.experimental.pallas import tpu as pltpu


# ---------------------------------------------------------------------------
# helpers
# ---------------------------------------------------------------------------
def _rup(x, m):
    return ((x + m - 1) // m) * m


def _pad2d(a, rows, cols):
    r, c = a.shape
    return jnp.pad(a, ((0, rows - r), (0, cols - c)))


def _vmem_capacity_bytes():
    try:
        info = pltpu.get_tpu_info()
        cap = getattr(info, "vmem_capacity_bytes", None)
        if cap:
            return int(cap)
    except Exception:
        pass
    return 64 * 1024 * 1024  # conservative default (v7x-sized VMEM)


def _spec(shape, index_map, buffers=None):
    """BlockSpec, optionally requesting `buffers`-deep pipelining."""
    if buffers is not None:
        try:
            return pl.BlockSpec(shape, index_map, pipeline_mode=pl.Buffered(buffers))
        except (TypeError, AttributeError):
            pass
    return pl.BlockSpec(shape, index_map)


def _log_softmax_masked(logits, nclass):
    # Mask the zero-padded class columns so they do not affect max / sum.
    col = jax.lax.broadcasted_iota(jnp.int32, logits.shape, 1)
    logits = jnp.where(col < nclass, logits, -1e30)
    m = jnp.max(logits, axis=1, keepdims=True)
    shifted = logits - m
    lse = jnp.log(jnp.sum(jnp.exp(shifted), axis=1, keepdims=True))
    return shifted - lse


# ---------------------------------------------------------------------------
# fused kernel (small graphs: whole padded problem resident in VMEM)
# ---------------------------------------------------------------------------
def _fused_kernel(x_ref, adj_ref, w1_ref, b1_ref, w2_ref, b2_ref, out_ref, *, nclass):
    s1 = jnp.dot(x_ref[...], w1_ref[...], preferred_element_type=jnp.float32)
    z1 = jnp.dot(adj_ref[...], s1.astype(jnp.bfloat16),
                 preferred_element_type=jnp.float32)
    # TODO(synk): F.dropout(training=True) RNG cannot be bit-matched to torch;
    # implemented as inference-mode dropout (identity).
    h = jnp.maximum(z1 + b1_ref[...], 0.0).astype(jnp.bfloat16)
    s2 = jnp.dot(h, w2_ref[...], preferred_element_type=jnp.float32)
    z2 = jnp.dot(adj_ref[...], s2.astype(jnp.bfloat16),
                 preferred_element_type=jnp.float32)
    out_ref[...] = _log_softmax_masked(z2 + b2_ref[...], nclass)


# ---------------------------------------------------------------------------
# tiled kernels (large graphs)
# ---------------------------------------------------------------------------
def _xw_kernel(x_ref, w_ref, s_ref):
    # s_tile = x_tile @ W1   (bf16 operands, f32 MXU accumulation, bf16 store)
    s_ref[...] = jnp.dot(
        x_ref[...], w_ref[...], preferred_element_type=jnp.float32
    ).astype(jnp.bfloat16)


def _agg1_kernel(adj_ref, s1_ref, b1_ref, w2_ref, s2_ref, acc_ref):
    # K-tiled: acc += adj(tm,tk) @ s1(tk,h); at k==last: relu(acc+b1) @ W2.
    k = pl.program_id(1)

    @pl.when(k == 0)
    def _():
        acc_ref[...] = jnp.zeros_like(acc_ref)

    acc_ref[...] += jnp.dot(adj_ref[...], s1_ref[...],
                            preferred_element_type=jnp.float32)

    @pl.when(k == pl.num_programs(1) - 1)
    def _():
        h = jnp.maximum(acc_ref[...] + b1_ref[...], 0.0).astype(jnp.bfloat16)
        s2_ref[...] = jnp.dot(
            h, w2_ref[...], preferred_element_type=jnp.float32
        ).astype(jnp.bfloat16)


def _agg2_kernel(adj_ref, s2_ref, b2_ref, out_ref, acc_ref, *, nclass):
    # K-tiled: acc += adj(tm,tk) @ s2(tk,c); at k==last: log_softmax(acc+b2).
    k = pl.program_id(1)

    @pl.when(k == 0)
    def _():
        acc_ref[...] = jnp.zeros_like(acc_ref)

    acc_ref[...] += jnp.dot(adj_ref[...], s2_ref[...],
                            preferred_element_type=jnp.float32)

    @pl.when(k == pl.num_programs(1) - 1)
    def _():
        out_ref[...] = _log_softmax_masked(acc_ref[...] + b2_ref[...], nclass)


# ---------------------------------------------------------------------------
# wrapper
# ---------------------------------------------------------------------------
def gcn_forward(x, adj, w1, b1, w2, b2, *, row_tile=None, k_tile=None,
                force_path=None):
    n, nfeat = x.shape
    nhid = w1.shape[1]
    nclass = w2.shape[1]

    # 128-aligned (lane-dense, full MXU output columns) padded dims.
    f_pad = _rup(nfeat, 128)
    h_pad = _rup(nhid, 128)
    c_pad = _rup(nclass, 128)
    n128 = _rup(n, 128)

    vmem_cap = _vmem_capacity_bytes()
    # ~54 MiB on 64 MiB v7x, ~110 MiB on 128 MiB v5e/v6e.
    vmem_limit = min(int(vmem_cap * 0.85), 110 * 1024 * 1024)

    # ---- fused vs tiled decision --------------------------------------------
    # Rough fused VMEM footprint: pallas-managed operands x2 (double buffers)
    # plus headroom for the f32 intermediates.
    fused_bytes = (
        2 * 2 * (n128 * n128 + n128 * f_pad + f_pad * h_pad + h_pad * c_pad)
        + 2 * 4 * n128 * c_pad
        + 4 * 3 * n128 * (h_pad + c_pad)
    )
    use_fused = fused_bytes <= int(0.6 * vmem_limit)
    if force_path == "fused":
        use_fused = True
    elif force_path == "tiled":
        use_fused = False

    b1_row = b1.reshape(1, -1).astype(jnp.float32)
    b2_row = b2.reshape(1, -1).astype(jnp.float32)

    # =========================== fused path ===================================
    if use_fused:
        x_p = _pad2d(x, n128, f_pad).astype(jnp.bfloat16)
        adj_p = _pad2d(adj, n128, n128).astype(jnp.bfloat16)
        w1_p = _pad2d(w1, f_pad, h_pad).astype(jnp.bfloat16)
        w2_p = _pad2d(w2, h_pad, c_pad).astype(jnp.bfloat16)
        b1_p = _pad2d(b1_row, 1, h_pad)
        b2_p = _pad2d(b2_row, 1, c_pad)

        def full(shape):
            return pl.BlockSpec(shape, lambda i: (0, 0))

        out_p = pl.pallas_call(
            functools.partial(_fused_kernel, nclass=nclass),
            out_shape=jax.ShapeDtypeStruct((n128, c_pad), jnp.float32),
            grid=(1,),
            in_specs=[full((n128, f_pad)), full((n128, n128)),
                      full((f_pad, h_pad)), full((1, h_pad)),
                      full((h_pad, c_pad)), full((1, c_pad))],
            out_specs=full((n128, c_pad)),
            compiler_params=pltpu.CompilerParams(
                dimension_semantics=("arbitrary",),
                vmem_limit_bytes=vmem_limit),
        )(x_p, adj_p, w1_p, b1_p, w2_p, b2_p)
        return out_p[:n, :nclass]

    # =========================== tiled path ====================================
    # Generation-adaptive tiles: bigger on 128 MiB VMEM chips, smaller on v7x.
    tile_target = 512 if vmem_cap >= 100 * 1024 * 1024 else 256
    tm = row_tile if row_tile is not None else tile_target
    tm = max(128, _rup(min(tm, n128), 128))
    if tm >= n128 and n128 >= 256:
        # Force >= 2 row steps so the "parallel" axis can use both v7x cores.
        tm = max(128, (n128 // 2) // 128 * 128)
    n_pad = _rup(n128, tm)

    tk = k_tile if k_tile is not None else tm
    tk = max(128, _rup(min(tk, n_pad), 128))
    if n_pad % tk:
        tk = tm  # tm always divides n_pad
    grid_r = n_pad // tm
    grid_k = n_pad // tk

    x_p = _pad2d(x, n_pad, f_pad).astype(jnp.bfloat16)
    adj_p = _pad2d(adj, n_pad, n_pad).astype(jnp.bfloat16)
    w1_p = _pad2d(w1, f_pad, h_pad).astype(jnp.bfloat16)
    w2_p = _pad2d(w2, h_pad, c_pad).astype(jnp.bfloat16)
    b1_p = _pad2d(b1_row, 1, h_pad)
    b2_p = _pad2d(b2_row, 1, c_pad)
    # TODO(synk): for very large graphs, quantizing adj to int8 (v5e/v6e) or
    # fp8 (v7x) with an explicit scale would halve the dominant HBM stream.

    cparams1 = pltpu.CompilerParams(
        dimension_semantics=("parallel",), vmem_limit_bytes=vmem_limit)
    cparams2 = pltpu.CompilerParams(
        dimension_semantics=("parallel", "arbitrary"), vmem_limit_bytes=vmem_limit)

    def run(adj_buffers):
        # ---- stage 1: s1 = x @ W1 (row-tiled, W1 resident) --------------------
        s1 = pl.pallas_call(
            _xw_kernel,
            out_shape=jax.ShapeDtypeStruct((n_pad, h_pad), jnp.bfloat16),
            grid=(grid_r,),
            in_specs=[pl.BlockSpec((tm, f_pad), lambda i: (i, 0)),
                      pl.BlockSpec((f_pad, h_pad), lambda i: (0, 0))],
            out_specs=pl.BlockSpec((tm, h_pad), lambda i: (i, 0)),
            compiler_params=cparams1,
        )(x_p, w1_p)

        # ---- stage 2: s2 = relu(adj @ s1 + b1) @ W2 (K-tiled) ------------------
        s2 = pl.pallas_call(
            _agg1_kernel,
            out_shape=jax.ShapeDtypeStruct((n_pad, c_pad), jnp.bfloat16),
            grid=(grid_r, grid_k),
            in_specs=[
                _spec((tm, tk), lambda i, k: (i, k), buffers=adj_buffers),
                pl.BlockSpec((tk, h_pad), lambda i, k: (k, 0)),
                pl.BlockSpec((1, h_pad), lambda i, k: (0, 0)),
                pl.BlockSpec((h_pad, c_pad), lambda i, k: (0, 0)),
            ],
            out_specs=pl.BlockSpec((tm, c_pad), lambda i, k: (i, 0)),
            scratch_shapes=[pltpu.VMEM((tm, h_pad), jnp.float32)],
            compiler_params=cparams2,
        )(adj_p, s1, b1_p, w2_p)

        # ---- stage 3: out = log_softmax(adj @ s2 + b2) (K-tiled) ---------------
        out_p = pl.pallas_call(
            functools.partial(_agg2_kernel, nclass=nclass),
            out_shape=jax.ShapeDtypeStruct((n_pad, c_pad), jnp.float32),
            grid=(grid_r, grid_k),
            in_specs=[
                _spec((tm, tk), lambda i, k: (i, k), buffers=adj_buffers),
                pl.BlockSpec((tk, c_pad), lambda i, k: (k, 0)),
                pl.BlockSpec((1, c_pad), lambda i, k: (0, 0)),
            ],
            out_specs=pl.BlockSpec((tm, c_pad), lambda i, k: (i, 0)),
            scratch_shapes=[pltpu.VMEM((tm, c_pad), jnp.float32)],
            compiler_params=cparams2,
        )(adj_p, s2, b2_p)
        return out_p

    try:
        out_p = run(adj_buffers=3)      # 3-deep adj pipelining (HBM-bound stages)
    except Exception:
        out_p = run(adj_buffers=None)   # fall back to default double buffering
    return out_p[:n, :nclass]


# ---------------------------------------------------------------------------
# parameter init + pure-JAX reference
# ---------------------------------------------------------------------------
def init_gc_params(key, in_features, out_features):
    # Matches GraphConvolution.reset_parameters(): uniform(-stdv, stdv),
    # stdv = 1 / sqrt(out_features), for both weight and bias.
    stdv = 1.0 / math.sqrt(out_features)
    kw, kb = jax.random.split(key)
    w = jax.random.uniform(kw, (in_features, out_features), jnp.float32, -stdv, stdv)
    b = jax.random.uniform(kb, (out_features,), jnp.float32, -stdv, stdv)
    return w, b


def reference_forward(x, adj, w1, b1, w2, b2):
    zz = adj @ (x @ w1) + b1
    h = jnp.maximum(zz, 0.0)
    logits = adj @ (h @ w2) + b2
    return jax.nn.log_softmax(logits, axis=1)


def make_graph(key, n, nfeat):
    k_x, k_adj = jax.random.split(key)
    x = jax.random.normal(k_x, (n, nfeat), jnp.float32)
    # Symmetrically-normalized random adjacency (self-loops included).
    a = (jax.random.uniform(k_adj, (n, n)) < 0.1).astype(jnp.float32)
    a = jnp.maximum(a, a.T) + jnp.eye(n, dtype=jnp.float32)
    deg_inv_sqrt = 1.0 / jnp.sqrt(a.sum(axis=1))
    adj = a * deg_inv_sqrt[:, None] * deg_inv_sqrt[None, :]
    return x, adj


# ---------------------------------------------------------------------------
if __name__ == "__main__":
    NFEAT, NHID, NCLASS = 64, 32, 16

    key = jax.random.PRNGKey(0)
    k_g1, k_g2, k_gc1, k_gc2 = jax.random.split(key, 4)

    w1, b1 = init_gc_params(k_gc1, NFEAT, NHID)
    w2, b2 = init_gc_params(k_gc2, NHID, NCLASS)

    # --- small graph: exercises the fused single-kernel path -----------------
    N1 = 128
    x1, adj1 = make_graph(k_g1, N1, NFEAT)
    out1 = jax.block_until_ready(gcn_forward(x1, adj1, w1, b1, w2, b2))
    ref1 = reference_forward(x1, adj1, w1, b1, w2, b2)
    assert out1.shape == (N1, NCLASS)
    err1 = float(jnp.max(jnp.abs(out1 - ref1)))
    assert err1 < 5e-2, f"fused path mismatch: max abs err {err1}"

    # --- larger graph: exercises the K-tiled large-graph path ----------------
    N2 = 320  # non-multiple of 128 -> exercises row padding; grid (3, 3)
    x2, adj2 = make_graph(k_g2, N2, NFEAT)
    out2 = jax.block_until_ready(
        gcn_forward(x2, adj2, w1, b1, w2, b2,
                    force_path="tiled", row_tile=128, k_tile=128))
    ref2 = reference_forward(x2, adj2, w1, b1, w2, b2)
    assert out2.shape == (N2, NCLASS)
    err2 = float(jnp.max(jnp.abs(out2 - ref2)))
    assert err2 < 5e-2, f"tiled path mismatch: max abs err {err2}"

    print("KERNEL_OK")
</pallas_src>

<mosaic_0001>
module attributes {stable_mosaic.version = 11 : i64} {
  func.func @_fused_kernel(%arg0: i32, %arg1: memref<128x128xbf16, #tpu.memory_space<vmem>>, %arg2: memref<128x128xbf16, #tpu.memory_space<vmem>>, %arg3: memref<128x128xbf16, #tpu.memory_space<vmem>>, %arg4: memref<1x128xf32, #tpu.memory_space<vmem>>, %arg5: memref<128x128xbf16, #tpu.memory_space<vmem>>, %arg6: memref<1x128xf32, #tpu.memory_space<vmem>>, %arg7: memref<128x128xf32, #tpu.memory_space<vmem>>) attributes {dimension_semantics = [#tpu.dimension_semantics<arbitrary>], iteration_bounds = array<i64: 1>, scalar_prefetch = 0 : i64, scratch_operands = 0 : i64, tpu.core_type = #tpu.core_type<tc>, window_params = [{pipeline_mode = #tpu.pipeline_mode<synchronous>, transform_indices = @transform_0, window_bounds = array<i64: 128, 128>}, {pipeline_mode = #tpu.pipeline_mode<synchronous>, transform_indices = @transform_1, window_bounds = array<i64: 128, 128>}, {pipeline_mode = #tpu.pipeline_mode<synchronous>, transform_indices = @transform_2, window_bounds = array<i64: 128, 128>}, {pipeline_mode = #tpu.pipeline_mode<synchronous>, transform_indices = @transform_3, window_bounds = array<i64: 1, 128>}, {pipeline_mode = #tpu.pipeline_mode<synchronous>, transform_indices = @transform_4, window_bounds = array<i64: 128, 128>}, {pipeline_mode = #tpu.pipeline_mode<synchronous>, transform_indices = @transform_5, window_bounds = array<i64: 1, 128>}, {pipeline_mode = #tpu.pipeline_mode<synchronous>, transform_indices = @transform_6, window_bounds = array<i64: 128, 128>}]} {
    %c0 = arith.constant 0 : index
    %c0_0 = arith.constant 0 : index
    %0 = vector.load %arg1[%c0, %c0_0] : memref<128x128xbf16, #tpu.memory_space<vmem>>, vector<128x128xbf16>
    %c0_1 = arith.constant 0 : index
    %c0_2 = arith.constant 0 : index
    %1 = vector.load %arg3[%c0_1, %c0_2] : memref<128x128xbf16, #tpu.memory_space<vmem>>, vector<128x128xbf16>
    %cst = arith.constant dense<0.000000e+00> : vector<128x128xf32>
    %2 = tpu.matmul %0, %1, %cst {dimension_numbers = #tpu.dot_dimension_numbers<[1], [0], [0], [1], [0, 0, 1, 1], [], []>} : vector<128x128xbf16>, vector<128x128xbf16>, vector<128x128xf32> -> vector<128x128xf32>
    %c0_3 = arith.constant 0 : index
    %c0_4 = arith.constant 0 : index
    %3 = vector.load %arg2[%c0_3, %c0_4] : memref<128x128xbf16, #tpu.memory_space<vmem>>, vector<128x128xbf16>
    %4 = arith.truncf %2 : vector<128x128xf32> to vector<128x128xbf16>
    %cst_5 = arith.constant dense<0.000000e+00> : vector<128x128xf32>
    %5 = tpu.matmul %3, %4, %cst_5 {dimension_numbers = #tpu.dot_dimension_numbers<[1], [0], [0], [1], [0, 0, 1, 1], [], []>} : vector<128x128xbf16>, vector<128x128xbf16>, vector<128x128xf32> -> vector<128x128xf32>
    %c0_6 = arith.constant 0 : index
    %c0_7 = arith.constant 0 : index
    %6 = vector.load %arg4[%c0_6, %c0_7] : memref<1x128xf32, #tpu.memory_space<vmem>>, vector<1x128xf32>
    %7 = vector.broadcast %6 : vector<1x128xf32> to vector<128x128xf32>
    %8 = arith.addf %5, %7 : vector<128x128xf32>
    %cst_8 = arith.constant 0.000000e+00 : f32
    %9 = vector.broadcast %cst_8 : f32 to vector<128x128xf32>
    %10 = arith.maximumf %8, %9 : vector<128x128xf32>
    %11 = arith.truncf %10 : vector<128x128xf32> to vector<128x128xbf16>
    %c0_9 = arith.constant 0 : index
    %c0_10 = arith.constant 0 : index
    %12 = vector.load %arg5[%c0_9, %c0_10] : memref<128x128xbf16, #tpu.memory_space<vmem>>, vector<128x128xbf16>
    %cst_11 = arith.constant dense<0.000000e+00> : vector<128x128xf32>
    %13 = tpu.matmul %11, %12, %cst_11 {dimension_numbers = #tpu.dot_dimension_numbers<[1], [0], [0], [1], [0, 0, 1, 1], [], []>} : vector<128x128xbf16>, vector<128x128xbf16>, vector<128x128xf32> -> vector<128x128xf32>
    %c0_12 = arith.constant 0 : index
    %c0_13 = arith.constant 0 : index
    %14 = vector.load %arg2[%c0_12, %c0_13] : memref<128x128xbf16, #tpu.memory_space<vmem>>, vector<128x128xbf16>
    %15 = arith.truncf %13 : vector<128x128xf32> to vector<128x128xbf16>
    %cst_14 = arith.constant dense<0.000000e+00> : vector<128x128xf32>
    %16 = tpu.matmul %14, %15, %cst_14 {dimension_numbers = #tpu.dot_dimension_numbers<[1], [0], [0], [1], [0, 0, 1, 1], [], []>} : vector<128x128xbf16>, vector<128x128xbf16>, vector<128x128xf32> -> vector<128x128xf32>
    %c0_15 = arith.constant 0 : index
    %c0_16 = arith.constant 0 : index
    %17 = vector.load %arg6[%c0_15, %c0_16] : memref<1x128xf32, #tpu.memory_space<vmem>>, vector<1x128xf32>
    %18 = vector.broadcast %17 : vector<1x128xf32> to vector<128x128xf32>
    %19 = arith.addf %16, %18 : vector<128x128xf32>
    %20 = tpu.iota {dimensions = array<i32: 1>} : vector<128x128xi32>
    %c16_i32 = arith.constant 16 : i32
    %21 = vector.broadcast %c16_i32 : i32 to vector<128x128xi32>
    %22 = arith.cmpi slt, %20, %21 : vector<128x128xi32>
    %cst_17 = arith.constant -1.000000e+30 : f32
    %23 = vector.broadcast %cst_17 : f32 to vector<128x128xf32>
    %24 = arith.select %22, %19, %23 : vector<128x128xi1>, vector<128x128xf32>
    %cst_18 = arith.constant dense<0xFF800000> : vector<128xf32>
    %25 = vector.multi_reduction <maximumf>, %24, %cst_18 [1] : vector<128x128xf32> to vector<128xf32>
    %26 = vector.shape_cast %25 : vector<128xf32> to vector<128x1xf32>
    %27 = vector.broadcast %26 : vector<128x1xf32> to vector<128x128xf32>
    %28 = arith.subf %24, %27 : vector<128x128xf32>
    %29 = math.exp %28 : vector<128x128xf32>
    %cst_19 = arith.constant dense<0.000000e+00> : vector<128xf32>
    %30 = vector.multi_reduction <add>, %29, %cst_19 [1] : vector<128x128xf32> to vector<128xf32>
    %31 = vector.shape_cast %30 : vector<128xf32> to vector<128x1xf32>
    %32 = math.log %31 : vector<128x1xf32>
    %33 = vector.broadcast %32 : vector<128x1xf32> to vector<128x128xf32>
    %34 = arith.subf %28, %33 : vector<128x128xf32>
    %c0_20 = arith.constant 0 : index
    %c0_21 = arith.constant 0 : index
    %35 = vector.load %arg7[%c0_20, %c0_21] : memref<128x128xf32, #tpu.memory_space<vmem>>, vector<128x128xf32>
    tpu.vector_store %arg7[%c0_20, %c0_21], %34 {strides = array<i32>} : memref<128x128xf32, #tpu.memory_space<vmem>>, vector<128x128xf32>,
    return
  }
  func.func @transform_0(%arg0: i32) -> (i32, i32) {
    %c0_i32 = arith.constant 0 : i32
    %c0_i32_0 = arith.constant 0 : i32
    %c0_i32_1 = arith.constant 0 : i32
    return %c0_i32, %c0_i32_0 : i32, i32
  }
  func.func @transform_1(%arg0: i32) -> (i32, i32) {
    %c0_i32 = arith.constant 0 : i32
    %c0_i32_0 = arith.constant 0 : i32
    %c0_i32_1 = arith.constant 0 : i32
    return %c0_i32, %c0_i32_0 : i32, i32
  }
  func.func @transform_2(%arg0: i32) -> (i32, i32) {
    %c0_i32 = arith.constant 0 : i32
    %c0_i32_0 = arith.constant 0 : i32
    %c0_i32_1 = arith.constant 0 : i32
    return %c0_i32, %c0_i32_0 : i32, i32
  }
  func.func @transform_3(%arg0: i32) -> (i32, i32) {
    %c0_i32 = arith.constant 0 : i32
    %c0_i32_0 = arith.constant 0 : i32
    %c0_i32_1 = arith.constant 0 : i32
    return %c0_i32, %c0_i32_0 : i32, i32
  }
  func.func @transform_4(%arg0: i32) -> (i32, i32) {
    %c0_i32 = arith.constant 0 : i32
    %c0_i32_0 = arith.constant 0 : i32
    %c0_i32_1 = arith.constant 0 : i32
    return %c0_i32, %c0_i32_0 : i32, i32
  }
  func.func @transform_5(%arg0: i32) -> (i32, i32) {
    %c0_i32 = arith.constant 0 : i32
    %c0_i32_0 = arith.constant 0 : i32
    %c0_i32_1 = arith.constant 0 : i32
    return %c0_i32, %c0_i32_0 : i32, i32
  }
  func.func @transform_6(%arg0: i32) -> (i32, i32) {
    %c0_i32 = arith.constant 0 : i32
    %c0_i32_0 = arith.constant 0 : i32
    %c0_i32_1 = arith.constant 0 : i32
    return %c0_i32, %c0_i32_0 : i32, i32
  }
}

</mosaic_0001>

<bundles_post_ra>
// kernel: tpu_custom_call.1
= control target key start
LH: loop header
LB: loop body
LE: loop exit
PB: predicated region body
PF: predicated region fallthrough
CT: control target
= control target key end

     0   :  { %11 = vsyncpa [#allocation3], 0  ;;  %s1663_s0 = inlined_call_operand.hbm [shape: bf16[128,128], index: 0, kind: input, shape index: {}]   ;;  %s1664_s1 = inlined_call_operand.hbm [shape: bf16[128,128], index: 1, kind: input, shape index: {}]   ;;  %s1665_s2 = inlined_call_operand.hbm [shape: bf16[128,128], index: 2, kind: input, shape index: {}]   ;;  %s1666_s3 = inlined_call_operand.vmem [shape: f32[1,128], index: 3, kind: input, shape index: {}]   ;;  %s1667_s4 = inlined_call_operand.hbm [shape: bf16[128,128], index: 4, kind: input, shape index: {}]   ;;  %s1668_s5 = inlined_call_operand.vmem [shape: f32[1,128], index: 5, kind: input, shape index: {}]   ;;  %s1669_s6 = inlined_call_operand.hbm [shape: f32[128,128], index: 6, kind: output, shape index: {}]  }
   0x1   :  { %12 = vsyncpa [#allocation6], 0 }
   0x2   :  { %13 = vsyncpa [#allocation9], 0 }
   0x3   :  { %14 = vsyncpa [#allocation4], 0  ;;  %s1431_s21 = smov [#allocation5]   ;;  %s1432_s23 = smov [#allocation2]  }
   0x4   :  { %s32_s22 = sshll.u32 %s1431_s21, 4  ;;  %s20_s24 = sshll.u32 %s1432_s23, 4  ;;  %s33_s22 = int_to_ptr.vmem [resolvable:$true] %s32_s22  ;;  %s21_s24 = int_to_ptr.vmem [resolvable:$true] %s20_s24 }
   0x5   :  { %s1331_s25 = scalar_lea.vmem %s33_s22, 1024  ;;  %p1336_p1 = scmp.lt.s32.totalorder %s33_s22, %s33_s22 }
   0x6   :  { %p1332_p0 = scmp.ne.s32.totalorder %s33_s22, %s1331_s25  ;;  %p1337_p2 = scmp.lt.s32.totalorder %s1331_s25, %s1331_s25 }
   0x8   :  { %p1338_p3 = por %p1337_p2, %p1336_p1 }
   0xa   :  { %p1339_p4 = pnand %p1338_p3, %p1332_p0 }
   0xc   :  { %1342 = shalt.err (!%p1339_p4)
}
   0xd   :  { %s1433_s26 = smov 64   ;;  %s1434_s27 = smov 4  }
   0xe   :  { %38 = dma.hbm_to_vmem [thread:$0]  %s1664_s1, 1024, %s33_s22, [#allocation6], %s1433_s26, %s1433_s26, %s1434_s27  }
   0xf   :  { %s1351_s30 = scalar_lea.vmem %s21_s24, 1024  ;;  %p1356_p6 = scmp.lt.s32.totalorder %s21_s24, %s21_s24 }
  0x10   :  { %p1352_p5 = scmp.ne.s32.totalorder %s21_s24, %s1351_s30  ;;  %p1357_p7 = scmp.lt.s32.totalorder %s1351_s30, %s1351_s30 }
  0x12   :  { %p1358_p8 = por %p1357_p7, %p1356_p6 }
  0x14   :  { %p1359_p9 = pnand %p1358_p8, %p1352_p5 }
  0x16   :  { %1362 = shalt.err (!%p1359_p9)
}
  0x17   :  { %26 = dma.hbm_to_vmem [thread:$0]  %s1663_s0, 1024, %s21_s24, [#allocation3], %s1433_s26, %s1433_s26, %s1434_s27  }
  0x18   :  { %s1435_s9 = smov [#allocation7]   ;;  %s1436_s11 = smov [#allocation8]  }
  0x19   :  { %s44_s10 = sshll.u32 %s1435_s9, 4  ;;  %s58_s12 = sshll.u32 %s1436_s11, 4  ;;  %s45_s10 = int_to_ptr.vmem [resolvable:$true] %s44_s10  ;;  %s59_s12 = int_to_ptr.vmem [resolvable:$true] %s58_s12 }
  0x1a   :  { %s1371_s1 = scalar_lea.vmem %s45_s10, 1024  ;;  %p1376_p11 = scmp.lt.s32.totalorder %s45_s10, %s45_s10 }
  0x1b   :  { %p1372_p10 = scmp.ne.s32.totalorder %s45_s10, %s1371_s1  ;;  %p1377_p12 = scmp.lt.s32.totalorder %s1371_s1, %s1371_s1 }
  0x1d   :  { %p1378_p13 = por %p1377_p12, %p1376_p11 }
  0x1f   :  { %p1379_p0 = pnand %p1378_p13, %p1372_p10 }
  0x21   :  { %1382 = shalt.err (!%p1379_p0)
}
  0x22   :  { %50 = dma.hbm_to_vmem [thread:$0]  %s1665_s2, 1024, %s45_s10, [#allocation6], %s1433_s26, %s1433_s26, %s1434_s27  }
  0x23   :  { %s1391_s0 = scalar_lea.vmem %s59_s12, 1024  ;;  %p1396_p2 = scmp.lt.s32.totalorder %s59_s12, %s59_s12 }
  0x24   :  { %p1392_p1 = scmp.ne.s32.totalorder %s59_s12, %s1391_s0  ;;  %p1397_p3 = scmp.lt.s32.totalorder %s1391_s0, %s1391_s0 }
  0x26   :  { %p1398_p4 = por %p1397_p3, %p1396_p2 }
  0x28   :  { %p1399_p5 = pnand %p1398_p4, %p1392_p1 }
  0x2a   :  { %1402 = shalt.err (!%p1399_p5)
}
  0x2b   :  { %64 = dma.hbm_to_vmem [thread:$0]  %s1667_s4, 1024, %s59_s12, [#allocation9], %s1433_s26, %s1433_s26, %s1434_s27  }
  0x2c   :  { %1423 = dma.done.wait [#allocation3], 1024  }
  0x2d   :  { %1424 = vsyncadd [#allocation3], 4294966272 }
  0x2e   :  { %1425 = dma.done.wait [#allocation6], 2048  }
  0x2f   :  { %1426 = vsyncadd [#allocation6], 4294965248 }
  0x30   :  { %1427 = dma.done.wait [#allocation9], 1024  }
  0x31   :  { %1428 = vsyncadd [#allocation9], 4294966272  ;;  %v1227_v0 = vld [vmem:[#allocation7 + $0x38] sm:$0xff]   ;;  %v1228_v1 = vld [vmem:[#allocation7 + $0x30] sm:$0xff]  }
  0x32   :  { %1090 = vmatprep.subr.bf16.mxu0 %v1227_v0  ;;  %v1229_v2 = vld [vmem:[#allocation7 + $0x28] sm:$0xff]   ;;  %v1230_v3 = vld [vmem:[#allocation7 + $0x20] sm:$0xff]   ;;  %v1231_v5 = vld [vmem:[#allocation7 + $0x18] sm:$0xff]  }
  0x33   :  { %1091 = vmatpush3.bf16.msra.mxu0 %v1227_v0  ;;  %v1235_v4 = vld [vmem:[#allocation2] sm:$0xff]   ;;  %v1232_v6 = vld [vmem:[#allocation7 + $0x10] sm:$0xff]   ;;  %v1233_v7 = vld [vmem:[#allocation7 + $0x8] sm:$0xff]  }
  0x34   :  { %1092 = vmatprep.subr.bf16.mxu0 %v1228_v1  ;;  %1106 = vmatprep.mubr.bf16.mxu0 %v1235_v4  ;;  %v1234_v8 = vld [vmem:[#allocation7] sm:$0xff]   ;;  %v1236_v9 = vld [vmem:[#allocation2 + $0x8] sm:$0xff]   ;;  %v1237_v10 = vld [vmem:[#allocation2 + $0x10] sm:$0xff]  }
  0x35   :  { %v1238_v11 = vld [vmem:[#allocation2 + $0x18] sm:$0xff]   ;;  %v1239_v12 = vld [vmem:[#allocation2 + $0x20] sm:$0xff]   ;;  %v1240_v13 = vld [vmem:[#allocation2 + $0x28] sm:$0xff]  }
  0x36   :  { %v1241_v14 = vld [vmem:[#allocation2 + $0x30] sm:$0xff]   ;;  %v1242_v15 = vld [vmem:[#allocation2 + $0x38] sm:$0xff]   ;;  %v1499_v16 = vld [vmem:[#allocation5] sm:$0xff]  }
  0x37   :  { %1093 = vmatpush3.bf16.msra.mxu0 %v1228_v1  ;;  %1138 = vmatprep.mubr.bf16.mxu1 %v1499_v16  ;;  %v1251_v17 = vld [vmem:[#allocation8 + $0x38] sm:$0xff]   ;;  %v1252_v18 = vld [vmem:[#allocation8 + $0x30] sm:$0xff]   ;;  %v1253_v19 = vld [vmem:[#allocation8 + $0x28] sm:$0xff]  }
  0x38   :  { %1094 = vmatprep.subr.bf16.mxu0 %v1229_v2  ;;  %v1254_v20 = vld [vmem:[#allocation8 + $0x20] sm:$0xff]   ;;  %v1255_v21 = vld [vmem:[#allocation8 + $0x18] sm:$0xff]   ;;  %v1502_v46 = vld [vmem:[#allocation5 + $0x8] sm:$0xff]  }
  0x39   :  { %v1504_v47 = vld [vmem:[#allocation5 + $0x10] sm:$0xff]   ;;  %v1508_v48 = vld [vmem:[#allocation5 + $0x18] sm:$0xff]   ;;  %v1510_v49 = vld [vmem:[#allocation5 + $0x20] sm:$0xff]  }
  0x3a   :  { %v1514_v50 = vld [vmem:[#allocation5 + $0x28] sm:$0xff]   ;;  %v1516_v51 = vld [vmem:[#allocation5 + $0x30] sm:$0xff]   ;;  %v1520_v52 = vld [vmem:[#allocation5 + $0x38] sm:$0xff]  }
  0x3b   :  { %1095 = vmatpush3.bf16.msra.mxu0 %v1229_v2  ;;  %v1256_v53 = vld [vmem:[#allocation8 + $0x10] sm:$0xff]   ;;  %v1257_v54 = vld [vmem:[#allocation8 + $0x8] sm:$0xff]   ;;  %v1258_v55 = vld [vmem:[#allocation8] sm:$0xff]  }
  0x3c   :  { %1096 = vmatprep.subr.bf16.mxu0 %v1230_v3  ;;  %v1008_v58 = vld [vmem:[%s1666_s3] ss:$0 sm:$0xff] }
  0x3f   :  { %1097 = vmatpush3.bf16.msra.mxu0 %v1230_v3 }
  0x40   :  { %1098 = vmatprep.subr.bf16.mxu0 %v1231_v5 }
  0x43   :  { %1099 = vmatpush3.bf16.msra.mxu0 %v1231_v5 }
  0x44   :  { %1100 = vmatprep.subr.bf16.mxu0 %v1232_v6 }
  0x47   :  { %1101 = vmatpush3.bf16.msra.mxu0 %v1232_v6 }
  0x48   :  { %1102 = vmatprep.subr.bf16.mxu0 %v1233_v7 }
  0x4b   :  { %1103 = vmatpush3.bf16.msra.mxu0 %v1233_v7 }
  0x4c   :  { %1104 = vmatprep.subr.bf16.mxu0 %v1234_v8 }
  0x4f   :  { %1105 = vmatpush3.bf16.msra.mxu0 %v1234_v8 }
  0x50   :  { %1154 = vmatprep.subr.bf16.mxu0 %v1251_v17 }
  0x52   :  { %1107 = vmatmul.mubr.bf16.vlgmr.msra.gmra.mxu0 %v1236_v9 }
  0x53   :  { %1110 = vmatprep.mubr.bf16.mxu0 %v1237_v10  ;;  %1155 = vmatpush3.bf16.msra.mxu0 %v1251_v17 }
  0x54   :  { %1156 = vmatprep.subr.bf16.mxu0 %v1252_v18 }
  0x57   :  { %1157 = vmatpush3.bf16.msra.mxu0 %v1252_v18 }
  0x58   :  { %1158 = vmatprep.subr.bf16.mxu0 %v1253_v19 }
  0x5a   :  { %1111 = vmatmul.mubr.bf16.gmra.mxu0 %v1238_v11 }
  0x5b   :  { %1114 = vmatprep.mubr.bf16.mxu0 %v1239_v12  ;;  %1159 = vmatpush3.bf16.msra.mxu0 %v1253_v19 }
  0x5c   :  { %1160 = vmatprep.subr.bf16.mxu0 %v1254_v20 }
  0x5f   :  { %1161 = vmatpush3.bf16.msra.mxu0 %v1254_v20 }
  0x60   :  { %1162 = vmatprep.subr.bf16.mxu0 %v1255_v21 }
  0x62   :  { %1115 = vmatmul.mubr.bf16.gmra.mxu0 %v1240_v13 }
  0x63   :  { %1118 = vmatprep.mubr.bf16.mxu0 %v1241_v14  ;;  %1163 = vmatpush3.bf16.msra.mxu0 %v1255_v21 }
  0x64   :  { %1164 = vmatprep.subr.bf16.mxu0 %v1256_v53 }
  0x67   :  { %1165 = vmatpush3.bf16.msra.mxu0 %v1256_v53 }
  0x68   :  { %1166 = vmatprep.subr.bf16.mxu0 %v1257_v54 }
  0x6a   :  { %1119 = vmatmul.mubr.bf16.gmra.mxu0 %v1242_v15 }
  0x6b   :  { %1167 = vmatpush3.bf16.msra.mxu0 %v1257_v54 }
  0x6c   :  { %1168 = vmatprep.subr.bf16.mxu0 %v1258_v55 }
  0x6f   :  { %1169 = vmatpush3.bf16.msra.mxu0 %v1258_v55 }
 0x112   :  { %v1108_v22 = vpop.f32.mrf.mxu0 }
 0x114   :  { %v242_v23 = vpop.f32.mrf.mxu0 }
 0x116   :  { %v1109_v24 = vpop.f32.mrf.mxu0 }
 0x117   :  { %v322_v44 = vpack.c.bf16 %v1109_v24, %v1108_v22 }
 0x118   :  { %v245_v25 = vpop.f32.mrf.mxu0 }
 0x119   :  { %v321_v45 = vpack.c.bf16 %v245_v25, %v242_v23 }
 0x11a   :  { %v1112_v26 = vpop.f32.mrf.mxu0 }
 0x11c   :  { %v258_v27 = vpop.f32.mrf.mxu0 }
 0x11e   :  { %v1113_v28 = vpop.f32.mrf.mxu0 }
 0x11f   :  { %v324_v42 = vpack.c.bf16 %v1113_v28, %v1112_v26 }
 0x120   :  { %v261_v29 = vpop.f32.mrf.mxu0 }
 0x121   :  { %v323_v43 = vpack.c.bf16 %v261_v29, %v258_v27 }
 0x122   :  { %v1116_v30 = vpop.f32.mrf.mxu0 }
 0x124   :  { %v274_v31 = vpop.f32.mrf.mxu0 }
 0x126   :  { %v1117_v32 = vpop.f32.mrf.mxu0 }
 0x127   :  { %v326_v40 = vpack.c.bf16 %v1117_v32, %v1116_v30 }
 0x128   :  { %v277_v33 = vpop.f32.mrf.mxu0 }
 0x129   :  { %v325_v41 = vpack.c.bf16 %v277_v33, %v274_v31 }
 0x12a   :  { %v1120_v34 = vpop.f32.mrf.mxu0 }
 0x12c   :  { %v290_v35 = vpop.f32.mrf.mxu0 }
 0x12e   :  { %v1121_v36 = vpop.f32.mrf.mxu0 }
 0x12f   :  { %v328_v37 = vpack.c.bf16 %v1121_v36, %v1120_v34 }
 0x130   :  { %v293_v38 = vpop.f32.mrf.mxu0 }
 0x131   :  { %v327_v39 = vpack.c.bf16 %v293_v38, %v290_v35  ;;  %1122 = vmatprep.subr.bf16.mxu1 %v328_v37 }
 0x132   :  { %1123 = vmatpush3.bf16.msra.mxu1 %v328_v37 }
 0x133   :  { %1124 = vmatprep.subr.bf16.mxu1 %v327_v39 }
 0x136   :  { %1125 = vmatpush3.bf16.msra.mxu1 %v327_v39 }
 0x137   :  { %1126 = vmatprep.subr.bf16.mxu1 %v326_v40 }
 0x13a   :  { %1127 = vmatpush3.bf16.msra.mxu1 %v326_v40 }
 0x13b   :  { %1128 = vmatprep.subr.bf16.mxu1 %v325_v41 }
 0x13e   :  { %1129 = vmatpush3.bf16.msra.mxu1 %v325_v41 }
 0x13f   :  { %1130 = vmatprep.subr.bf16.mxu1 %v324_v42 }
 0x142   :  { %1131 = vmatpush3.bf16.msra.mxu1 %v324_v42 }
 0x143   :  { %1132 = vmatprep.subr.bf16.mxu1 %v323_v43 }
 0x146   :  { %1133 = vmatpush3.bf16.msra.mxu1 %v323_v43 }
 0x147   :  { %1134 = vmatprep.subr.bf16.mxu1 %v322_v44 }
 0x14a   :  { %1135 = vmatpush3.bf16.msra.mxu1 %v322_v44 }
 0x14b   :  { %1136 = vmatprep.subr.bf16.mxu1 %v321_v45 }
 0x14e   :  { %1137 = vmatpush3.bf16.msra.mxu1 %v321_v45 }
 0x151   :  { %1139 = vmatmul.mubr.bf16.vlgmr.msra.gmra.mxu1 %v1502_v46 }
 0x152   :  { %1142 = vmatprep.mubr.bf16.mxu1 %v1504_v47 }
 0x159   :  { %1143 = vmatmul.mubr.bf16.gmra.mxu1 %v1508_v48 }
 0x15a   :  { %1146 = vmatprep.mubr.bf16.mxu1 %v1510_v49 }
 0x161   :  { %1147 = vmatmul.mubr.bf16.gmra.mxu1 %v1514_v50 }
 0x162   :  { %1150 = vmatprep.mubr.bf16.mxu1 %v1516_v51 }
 0x169   :  { %1151 = vmatmul.mubr.bf16.gmra.mxu1 %v1520_v52 }
 0x16a   :  { %1202 = vmatprep.mubr.bf16.mxu1 %v1499_v16 }
 0x211   :  { %v1140_v56 = vpop.f32.mrf.mxu1 }
 0x212   :  { %v427_v62 = vadd.f32 %v1140_v56, %v1008_v58 }
 0x213   :  { %v418_v57 = vpop.f32.mrf.mxu1 }
 0x214   :  { %v419_v60 = vadd.f32 %v1008_v58, %v418_v57  ;;  %v483_v5 = vmax.f32 %v427_v62, 0.0 }
 0x215   :  { %v1141_v59 = vpop.f32.mrf.mxu1 }
 0x216   :  { %v430_v61 = vadd.f32 %v1141_v59, %v1008_v58  ;;  %v481_v3 = vmax.f32 %v419_v60, 0.0 }
 0x217   :  { %v421_v63 = vpop.f32.mrf.mxu1 }
 0x218   :  { %v422_v0 = vadd.f32 %v1008_v58, %v421_v63  ;;  %v484_v1 = vmax.f32 %v430_v61, 0.0 }
 0x219   :  { %v1144_v2 = vpop.f32.mrf.mxu1 }
 0x21a   :  { %v482_v4 = vmax.f32 %v422_v0, 0.0  ;;  %v498_v8 = vpack.c.bf16 %v484_v1, %v483_v5  ;;  %v443_v12 = vadd.f32 %v1144_v2, %v1008_v58 }
 0x21b   :  { %v434_v6 = vpop.f32.mrf.mxu1 }
 0x21c   :  { %v497_v7 = vpack.c.bf16 %v482_v4, %v481_v3  ;;  %v435_v10 = vadd.f32 %v1008_v58, %v434_v6  ;;  %v487_v19 = vmax.f32 %v443_v12, 0.0 }
 0x21d   :  { %v1145_v9 = vpop.f32.mrf.mxu1 }
 0x21e   :  { %v446_v11 = vadd.f32 %v1145_v9, %v1008_v58  ;;  %1170 = vmatprep.mubr.bf16.mxu0 %v497_v7  ;;  %v485_v17 = vmax.f32 %v435_v10, 0.0 }
 0x21f   :  { %v437_v13 = vpop.f32.mrf.mxu1  ;;  %1171 = vmatmul.mubr.bf16.vlgmr.msra.gmra.mxu0 %v498_v8 }
 0x220   :  { %v438_v14 = vadd.f32 %v1008_v58, %v437_v13  ;;  %v488_v15 = vmax.f32 %v446_v11, 0.0 }
 0x221   :  { %v1148_v16 = vpop.f32.mrf.mxu1 }
 0x222   :  { %v486_v18 = vmax.f32 %v438_v14, 0.0  ;;  %v500_v22 = vpack.c.bf16 %v488_v15, %v487_v19  ;;  %v459_v26 = vadd.f32 %v1148_v16, %v1008_v58  ;;  %v778_v16 = vlaneseq }
 0x223   :  { %v450_v20 = vpop.f32.mrf.mxu1 }
 0x224   :  { %v499_v21 = vpack.c.bf16 %v486_v18, %v485_v17  ;;  %v451_v24 = vadd.f32 %v1008_v58, %v450_v20  ;;  %v491_v33 = vmax.f32 %v459_v26, 0.0  ;;  %v1534_v17 = vand.u32 127, %v778_v16  ;;  %v1025_v18 = vld [vmem:[%s1668_s5] ss:$0 sm:$0xff]  ;;  %s1437_s5 = smov [#allocation10]  }
 0x225   :  { %v1149_v23 = vpop.f32.mrf.mxu1  ;;  %s978_s18 = sshll.u32 %s1437_s5, 4  ;;  %s979_s18 = int_to_ptr.vmem [resolvable:$true] %s978_s18 }
 0x226   :  { %v462_v25 = vadd.f32 %v1149_v23, %v1008_v58  ;;  %1174 = vmatprep.mubr.bf16.mxu0 %v499_v21  ;;  %v489_v31 = vmax.f32 %v451_v24, 0.0  ;;  %vm780_vm0 = vcmp.lt.s32.totalorder %v1534_v17, 16  ;;  %s1403_s19 = scalar_lea.vmem %s979_s18, 2048  ;;  %p1408_p7 = scmp.lt.s32.totalorder %s979_s18, %s979_s18 }
 0x227   :  { %v453_v27 = vpop.f32.mrf.mxu1  ;;  %1175 = vmatmul.mubr.bf16.gmra.mxu0 %v500_v22  ;;  %p1404_p6 = scmp.ne.s32.totalorder %s979_s18, %s1403_s19  ;;  %p1409_p8 = scmp.lt.s32.totalorder %s1403_s19, %s1403_s19 }
 0x228   :  { %v454_v28 = vadd.f32 %v1008_v58, %v453_v27  ;;  %v492_v29 = vmax.f32 %v462_v25, 0.0 }
 0x229   :  { %v1152_v30 = vpop.f32.mrf.mxu1  ;;  %p1410_p9 = por %p1409_p8, %p1408_p7 }
 0x22a   :  { %v490_v32 = vmax.f32 %v454_v28, 0.0  ;;  %v502_v36 = vpack.c.bf16 %v492_v29, %v491_v33  ;;  %v475_v40 = vadd.f32 %v1152_v30, %v1008_v58 }
 0x22b   :  { %v466_v34 = vpop.f32.mrf.mxu1  ;;  %p1411_p10 = pnand %p1410_p9, %p1404_p6 }
 0x22c   :  { %v501_v35 = vpack.c.bf16 %v490_v32, %v489_v31  ;;  %v467_v38 = vadd.f32 %v1008_v58, %v466_v34  ;;  %v495_v53 = vmax.f32 %v475_v40, 0.0 }
 0x22d   :  { %v1153_v37 = vpop.f32.mrf.mxu1 }
 0x22e   :  { %v478_v39 = vadd.f32 %v1153_v37, %v1008_v58  ;;  %1178 = vmatprep.mubr.bf16.mxu0 %v501_v35  ;;  %v493_v44 = vmax.f32 %v467_v38, 0.0 }
 0x22f   :  { %v469_v41 = vpop.f32.mrf.mxu1  ;;  %1179 = vmatmul.mubr.bf16.gmra.mxu0 %v502_v36 }
 0x230   :  { %v470_v42 = vadd.f32 %v1008_v58, %v469_v41  ;;  %v496_v43 = vmax.f32 %v478_v39, 0.0 }
 0x232   :  { %v494_v45 = vmax.f32 %v470_v42, 0.0  ;;  %v504_v55 = vpack.c.bf16 %v496_v43, %v495_v53 }
 0x234   :  { %v503_v54 = vpack.c.bf16 %v494_v45, %v493_v44 }
 0x236   :  { %1182 = vmatprep.mubr.bf16.mxu0 %v503_v54 }
 0x237   :  { %1183 = vmatmul.mubr.bf16.gmra.mxu0 %v504_v55 }
 0x2df   :  { %v1172_v56 = vpop.f32.mrf.mxu0 }
 0x2e1   :  { %v603_v57 = vpop.f32.mrf.mxu0 }
 0x2e3   :  { %v1173_v59 = vpop.f32.mrf.mxu0 }
 0x2e4   :  { %v667_v14 = vpack.c.bf16 %v1173_v59, %v1172_v56 }
 0x2e5   :  { %v606_v60 = vpop.f32.mrf.mxu0 }
 0x2e6   :  { %v666_v15 = vpack.c.bf16 %v606_v60, %v603_v57 }
 0x2e7   :  { %v1176_v61 = vpop.f32.mrf.mxu0 }
 0x2e9   :  { %v619_v62 = vpop.f32.mrf.mxu0 }
 0x2eb   :  { %v1177_v63 = vpop.f32.mrf.mxu0 }
 0x2ec   :  { %v669_v12 = vpack.c.bf16 %v1177_v63, %v1176_v61 }
 0x2ed   :  { %v622_v0 = vpop.f32.mrf.mxu0 }
 0x2ee   :  { %v668_v13 = vpack.c.bf16 %v622_v0, %v619_v62 }
 0x2ef   :  { %v1180_v1 = vpop.f32.mrf.mxu0 }
 0x2f1   :  { %v635_v2 = vpop.f32.mrf.mxu0 }
 0x2f3   :  { %v1181_v3 = vpop.f32.mrf.mxu0 }
 0x2f4   :  { %v671_v10 = vpack.c.bf16 %v1181_v3, %v1180_v1 }
 0x2f5   :  { %v638_v58 = vpop.f32.mrf.mxu0 }
 0x2f6   :  { %v670_v11 = vpack.c.bf16 %v638_v58, %v635_v2 }
 0x2f7   :  { %v1184_v4 = vpop.f32.mrf.mxu0 }
 0x2f9   :  { %v651_v5 = vpop.f32.mrf.mxu0 }
 0x2fb   :  { %v1185_v6 = vpop.f32.mrf.mxu0 }
 0x2fc   :  { %v673_v7 = vpack.c.bf16 %v1185_v6, %v1184_v4 }
 0x2fd   :  { %v654_v8 = vpop.f32.mrf.mxu0 }
 0x2fe   :  { %v672_v9 = vpack.c.bf16 %v654_v8, %v651_v5  ;;  %1186 = vmatprep.subr.bf16.mxu1 %v673_v7 }
 0x2ff   :  { %1187 = vmatpush3.bf16.msra.mxu1 %v673_v7 }
 0x300   :  { %1188 = vmatprep.subr.bf16.mxu1 %v672_v9 }
 0x303   :  { %1189 = vmatpush3.bf16.msra.mxu1 %v672_v9 }
 0x304   :  { %1190 = vmatprep.subr.bf16.mxu1 %v671_v10 }
 0x307   :  { %1191 = vmatpush3.bf16.msra.mxu1 %v671_v10 }
 0x308   :  { %1192 = vmatprep.subr.bf16.mxu1 %v670_v11 }
 0x30b   :  { %1193 = vmatpush3.bf16.msra.mxu1 %v670_v11 }
 0x30c   :  { %1194 = vmatprep.subr.bf16.mxu1 %v669_v12 }
 0x30f   :  { %1195 = vmatpush3.bf16.msra.mxu1 %v669_v12 }
 0x310   :  { %1196 = vmatprep.subr.bf16.mxu1 %v668_v13 }
 0x313   :  { %1197 = vmatpush3.bf16.msra.mxu1 %v668_v13 }
 0x314   :  { %1198 = vmatprep.subr.bf16.mxu1 %v667_v14 }
 0x317   :  { %1199 = vmatpush3.bf16.msra.mxu1 %v667_v14 }
 0x318   :  { %1200 = vmatprep.subr.bf16.mxu1 %v666_v15 }
 0x31b   :  { %1201 = vmatpush3.bf16.msra.mxu1 %v666_v15 }
 0x31e   :  { %1203 = vmatmul.mubr.bf16.vlgmr.msra.gmra.mxu1 %v1502_v46 }
 0x31f   :  { %1206 = vmatprep.mubr.bf16.mxu1 %v1504_v47 }
 0x326   :  { %1207 = vmatmul.mubr.bf16.gmra.mxu1 %v1508_v48 }
 0x327   :  { %1210 = vmatprep.mubr.bf16.mxu1 %v1510_v49 }
 0x32e   :  { %1211 = vmatmul.mubr.bf16.gmra.mxu1 %v1514_v50 }
 0x32f   :  { %1214 = vmatprep.mubr.bf16.mxu1 %v1516_v51 }
 0x336   :  { %1215 = vmatmul.mubr.bf16.gmra.mxu1 %v1520_v52 }
 0x3de   :  { %v1204_v46 = vpop.f32.mrf.mxu1 }
 0x3df   :  { %v724_v47 = vadd.f32 %v1204_v46, %v1025_v18 }
 0x3e0   :  { %v715_v48 = vpop.f32.mrf.mxu1 }
 0x3e1   :  { %v716_v19 = vadd.f32 %v1025_v18, %v715_v48  ;;  %v783_v49 = vsel %vm780_vm0, %v724_v47, -1e+30 }
 0x3e2   :  { %801 = vmax.xlane.f32.xlu1 %v783_v49  ;;  %v1205_v50 = vpop.f32.mrf.mxu1 }
 0x3e3   :  { %v727_v51 = vadd.f32 %v1205_v50, %v1025_v18  ;;  %v781_v52 = vsel %vm780_vm0, %v716_v19, -1e+30 }
 0x3e4   :  { %v718_v20 = vpop.f32.mrf.mxu1  ;;  %797 = vmax.xlane.f32.xlu0 %v781_v52 }
 0x3e5   :  { %v719_v21 = vadd.f32 %v1025_v18, %v718_v20  ;;  %v784_v22 = vsel %vm780_vm0, %v727_v51, -1e+30 }
 0x3e6   :  { %803 = vmax.xlane.f32.xlu1 %v784_v22  ;;  %v1208_v23 = vpop.f32.mrf.mxu1 }
 0x3e7   :  { %v740_v24 = vadd.f32 %v1208_v23, %v1025_v18  ;;  %v782_v25 = vsel %vm780_vm0, %v719_v21, -1e+30 }
 0x3e8   :  { %v731_v26 = vpop.f32.mrf.mxu1  ;;  %799 = vmax.xlane.f32.xlu0 %v782_v25 }
 0x3e9   :  { %v732_v28 = vadd.f32 %v1025_v18, %v731_v26  ;;  %v787_v30 = vsel %vm780_vm0, %v740_v24, -1e+30 }
 0x3ea   :  { %v1209_v27 = vpop.f32.mrf.mxu1 }
 0x3eb   :  { %v743_v29 = vadd.f32 %v1209_v27, %v1025_v18  ;;  %v785_v36 = vsel %vm780_vm0, %v732_v28, -1e+30 }
 0x3ec   :  { %v734_v31 = vpop.f32.mrf.mxu1  ;;  %809 = vmax.xlane.f32.xlu0 %v787_v30 }
 0x3ed   :  { %v735_v32 = vadd.f32 %v1025_v18, %v734_v31  ;;  %v788_v33 = vsel %vm780_vm0, %v743_v29, -1e+30 }
 0x3ee   :  { %811 = vmax.xlane.f32.xlu1 %v788_v33  ;;  %v1212_v34 = vpop.f32.mrf.mxu1 }
 0x3ef   :  { %v756_v35 = vadd.f32 %v1212_v34, %v1025_v18  ;;  %v786_v38 = vsel %vm780_vm0, %v735_v32, -1e+30 }
 0x3f0   :  { %v747_v37 = vpop.f32.mrf.mxu1  ;;  %805 = vmax.xlane.f32.xlu0 %v785_v36 }
 0x3f1   :  { %v748_v40 = vadd.f32 %v1025_v18, %v747_v37  ;;  %v791_v42 = vsel %vm780_vm0, %v756_v35, -1e+30 }
 0x3f2   :  { %v1213_v39 = vpop.f32.mrf.mxu1  ;;  %807 = vmax.xlane.f32.xlu1 %v786_v38 }
 0x3f3   :  { %v759_v41 = vadd.f32 %v1213_v39, %v1025_v18  ;;  %v1562_v54 = vsel %vm780_vm0, %v748_v40, -1e+30 }
 0x3f4   :  { %v750_v43 = vpop.f32.mrf.mxu1  ;;  %817 = vmax.xlane.f32.xlu0 %v791_v42 }
 0x3f5   :  { %v751_v44 = vadd.f32 %v1025_v18, %v750_v43  ;;  %v792_v45 = vsel %vm780_vm0, %v759_v41, -1e+30 }
 0x3f6   :  { %v1216_v53 = vpop.f32.mrf.mxu1  ;;  %819 = vmax.xlane.f32.xlu1 %v792_v45 }
 0x3f7   :  { %v1567_v57 = vsel %vm780_vm0, %v751_v44, -1e+30  ;;  %v772_v60 = vadd.f32 %v1216_v53, %v1025_v18 }
 0x3f8   :  { %v763_v55 = vpop.f32.mrf.mxu1  ;;  %813 = vmax.xlane.f32.xlu0 %v1562_v54 }
 0x3f9   :  { %v764_v56 = vadd.f32 %v1025_v18, %v763_v55  ;;  %v1581_v2 = vsel %vm780_vm0, %v772_v60, -1e+30 }
 0x3fa   :  { %v1217_v59 = vpop.f32.mrf.mxu1  ;;  %815 = vmax.xlane.f32.xlu1 %v1567_v57 }
 0x3fb   :  { %v1572_v61 = vsel %vm780_vm0, %v764_v56, -1e+30  ;;  %v775_v0 = vadd.f32 %v1217_v59, %v1025_v18 }
 0x3fc   :  { %v766_v62 = vpop.f32.mrf.mxu1  ;;  %821 = vmax.xlane.f32.xlu0 %v1572_v61 }
 0x3fd   :  { %v767_v63 = vadd.f32 %v1025_v18, %v766_v62  ;;  %v1587_v3 = vsel %vm780_vm0, %v775_v0, -1e+30 }
 0x3ff   :  { %v1577_v1 = vsel %vm780_vm0, %v767_v63, -1e+30 }
 0x400   :  { %823 = vmax.xlane.f32.xlu1 %v1577_v1  ;;  %825 = vmax.xlane.f32.xlu0 %v1581_v2 }
 0x404   :  { %827 = vmax.xlane.f32.xlu1 %v1587_v3 }
 0x46b   :  { %v802_v58 = vpop.xlane.xlu1 %801 }
 0x46c   :  { %v1590_v4 = vsub.f32 %v783_v49, %v802_v58 }
 0x46d   :  { %v798_v5 = vpop.xlane.xlu0 %797 }
 0x46e   :  { %v849_v6 = vmul.f32 1.442695, %v1590_v4  ;;  %v1593_v7 = vsub.f32 %v781_v52, %v798_v5 }
 0x46f   :  { %v804_v8 = vpop.xlane.xlu1 %803 }
 0x470   :  { %1259 = vpow2.f32 %v849_v6  ;;  %v845_v9 = vmul.f32 1.442695, %v1593_v7  ;;  %v1596_v10 = vsub.f32 %v784_v22, %v804_v8 }
 0x471   :  { %v800_v11 = vpop.xlane.xlu0 %799 }
 0x472   :  { %v851_v12 = vmul.f32 1.442695, %v1596_v10  ;;  %v1599_v13 = vsub.f32 %v782_v25, %v800_v11  ;;  %1261 = vpow2.f32 %v845_v9 }
 0x474   :  { %1263 = vpow2.f32 %v851_v12  ;;  %v847_v14 = vmul.f32 1.442695, %v1599_v13 }
 0x475   :  { %v810_v15 = vpop.xlane.xlu0 %809 }
 0x476   :  { %v1602_v16 = vsub.f32 %v787_v30, %v810_v15  ;;  %1265 = vpow2.f32 %v847_v14 }
 0x477   :  { %v812_v17 = vpop.xlane.xlu1 %811 }
 0x478   :  { %v857_v18 = vmul.f32 1.442695, %v1602_v16  ;;  %v1605_v46 = vsub.f32 %v788_v33, %v812_v17 }
 0x479   :  { %v806_v47 = vpop.xlane.xlu0 %805 }
 0x47a   :  { %1267 = vpow2.f32 %v857_v18  ;;  %v859_v48 = vmul.f32 1.442695, %v1605_v46  ;;  %v1608_v19 = vsub.f32 %v785_v36, %v806_v47 }
 0x47b   :  { %v808_v49 = vpop.xlane.xlu1 %807 }
 0x47c   :  { %1269 = vpow2.f32 %v859_v48  ;;  %v853_v50 = vmul.f32 1.442695, %v1608_v19  ;;  %v1611_v51 = vsub.f32 %v786_v38, %v808_v49 }
 0x47d   :  { %v1260_v52 = vpop.eup %1259  ;;  %v818_v20 = vpop.xlane.xlu0 %817 }
 0x47e   :  { %1271 = vpow2.f32 %v853_v50  ;;  %v855_v21 = vmul.f32 1.442695, %v1611_v51  ;;  %v1614_v22 = vsub.f32 %v791_v42, %v818_v20  ;;  %881 = vadd.xlane.f32.xlu0 %v1260_v52 }
 0x47f   :  { %v820_v23 = vpop.xlane.xlu1 %819  ;;  %v1262_v24 = vpop.eup %1261 }
 0x480   :  { %1273 = vpow2.f32 %v855_v21  ;;  %v865_v25 = vmul.f32 1.442695, %v1614_v22  ;;  %v1617_v26 = vsub.f32 %v792_v45, %v820_v23 }
 0x481   :  { %v1264_v27 = vpop.eup %1263  ;;  %v814_v28 = vpop.xlane.xlu0 %813 }
 0x482   :  { %1275 = vpow2.f32 %v865_v25  ;;  %v867_v29 = vmul.f32 1.442695, %v1617_v26  ;;  %v1621_v30 = vsub.f32 %v1562_v54, %v814_v28  ;;  %883 = vadd.xlane.f32.xlu1 %v1264_v27  ;;  %877 = vadd.xlane.f32.xlu0 %v1262_v24 }
 0x483   :  { %v816_v31 = vpop.xlane.xlu1 %815  ;;  %v1266_v34 = vpop.eup %1265 }
 0x484   :  { %1277 = vpow2.f32 %v867_v29  ;;  %v861_v32 = vmul.f32 1.442695, %v1621_v30  ;;  %v1625_v33 = vsub.f32 %v1567_v57, %v816_v31 }
 0x485   :  { %v822_v35 = vpop.xlane.xlu0 %821 }
 0x486   :  { %1279 = vpow2.f32 %v861_v32  ;;  %v863_v36 = vmul.f32 1.442695, %v1625_v33  ;;  %v1629_v37 = vsub.f32 %v1572_v61, %v822_v35  ;;  %879 = vadd.xlane.f32.xlu1 %v1266_v34 }
 0x487   :  { %v1268_v38 = vpop.eup %1267 }
 0x488   :  { %1281 = vpow2.f32 %v863_v36  ;;  %v869_v39 = vmul.f32 1.442695, %v1629_v37  ;;  %889 = vadd.xlane.f32.xlu0 %v1268_v38 }
 0x489   :  { %v1270_v40 = vpop.eup %1269  ;;  %v824_v41 = vpop.xlane.xlu1 %823 }
 0x48a   :  { %v826_v42 = vpop.xlane.xlu0 %825  ;;  %1283 = vpow2.f32 %v869_v39  ;;  %v1633_v43 = vsub.f32 %v1577_v1, %v824_v41  ;;  %891 = vadd.xlane.f32.xlu1 %v1270_v40 }
 0x48b   :  { %v1636_v44 = vsub.f32 %v1581_v2, %v826_v42  ;;  %v1272_v45 = vpop.eup %1271 }
 0x48c   :  { %v871_v53 = vmul.f32 1.442695, %v1633_v43  ;;  %885 = vadd.xlane.f32.xlu0 %v1272_v45 }
 0x48d   :  { %v873_v54 = vmul.f32 1.442695, %v1636_v44  ;;  %v1274_v55 = vpop.eup %1273  ;;  %v828_v56 = vpop.xlane.xlu1 %827 }
 0x48e   :  { %1285 = vpow2.f32 %v871_v53  ;;  %v1641_v57 = vsub.f32 %v1587_v3, %v828_v56  ;;  %887 = vadd.xlane.f32.xlu1 %v1274_v55 }
 0x48f   :  { %v1276_v59 = vpop.eup %1275  ;;  %1287 = vpow2.f32 %v873_v54 }
 0x490   :  { %v875_v60 = vmul.f32 1.442695, %v1641_v57  ;;  %897 = vadd.xlane.f32.xlu0 %v1276_v59 }
 0x491   :  { %v1278_v61 = vpop.eup %1277 }
 0x492   :  { %1289 = vpow2.f32 %v875_v60  ;;  %899 = vadd.xlane.f32.xlu1 %v1278_v61 }
 0x493   :  { %v1280_v62 = vpop.eup %1279 }
 0x494   :  { %893 = vadd.xlane.f32.xlu0 %v1280_v62 }
 0x495   :  { %v1282_v63 = vpop.eup %1281 }
 0x496   :  { %895 = vadd.xlane.f32.xlu1 %v1282_v63 }
 0x497   :  { %v1284_v0 = vpop.eup %1283 }
 0x498   :  { %901 = vadd.xlane.f32.xlu0 %v1284_v0 }
 0x49b   :  { %v1286_v1 = vpop.eup %1285 }
 0x49c   :  { %v1288_v2 = vpop.eup %1287  ;;  %903 = vadd.xlane.f32.xlu1 %v1286_v1 }
 0x49d   :  { %905 = vadd.xlane.f32.xlu0 %v1288_v2 }
 0x49f   :  { %v1290_v3 = vpop.eup %1289 }
 0x4a0   :  { %907 = vadd.xlane.f32.xlu1 %v1290_v3 }
 0x507   :  { %v882_v58 = vpop.xlane.xlu0 %881 }
 0x508   :  { %1291 = vlog2.f32 %v882_v58 }
 0x50b   :  { %v884_v5 = vpop.xlane.xlu1 %883  ;;  %v878_v6 = vpop.xlane.xlu0 %877 }
 0x50c   :  { %1293 = vlog2.f32 %v884_v5 }
 0x50d   :  { %1295 = vlog2.f32 %v878_v6 }
 0x50f   :  { %v880_v8 = vpop.xlane.xlu1 %879 }
 0x510   :  { %1297 = vlog2.f32 %v880_v8 }
 0x511   :  { %v890_v9 = vpop.xlane.xlu0 %889 }
 0x512   :  { %1299 = vlog2.f32 %v890_v9 }
 0x513   :  { %v892_v11 = vpop.xlane.xlu1 %891 }
 0x514   :  { %1301 = vlog2.f32 %v892_v11 }
 0x515   :  { %v1292_v12 = vpop.eup %1291  ;;  %v886_v14 = vpop.xlane.xlu0 %885 }
 0x516   :  { %v914_v15 = vmul.f32 0.6931472, %v1292_v12  ;;  %1303 = vlog2.f32 %v886_v14 }
 0x517   :  { %v888_v17 = vpop.xlane.xlu1 %887 }
 0x518   :  { %v943_v18 = vsub.f32 %v1590_v4, %v914_v15  ;;  %1305 = vlog2.f32 %v888_v17 }
 0x519   :  { %v1294_v47 = vpop.eup %1293  ;;  %v898_v48 = vpop.xlane.xlu0 %897 }
 0x51a   :  { %v1296_v49 = vpop.eup %1295  ;;  %959 = vst [vmem:[#allocation10 + $0x10] sm:$0xff] %v943_v18  ;;  %v916_v50 = vmul.f32 0.6931472, %v1294_v47  ;;  %1307 = vlog2.f32 %v898_v48 }
 0x51b   :  { %v910_v52 = vmul.f32 0.6931472, %v1296_v49  ;;  %v900_v20 = vpop.xlane.xlu1 %899 }
 0x51c   :  { %v944_v21 = vsub.f32 %v1596_v10, %v916_v50  ;;  %1309 = vlog2.f32 %v900_v20 }
 0x51d   :  { %v1298_v23 = vpop.eup %1297  ;;  %v941_v24 = vsub.f32 %v1593_v7, %v910_v52  ;;  %v894_v25 = vpop.xlane.xlu0 %893 }
 0x51e   :  { %960 = vst [vmem:[#allocation10 + $0x18] sm:$0xff] %v944_v21  ;;  %v912_v27 = vmul.f32 0.6931472, %v1298_v23  ;;  %1311 = vlog2.f32 %v894_v25 }
 0x51f   :  { %v1300_v4 = vpop.eup %1299  ;;  %957 = vst [vmem:[#allocation10] sm:$0xff] %v941_v24  ;;  %v896_v28 = vpop.xlane.xlu1 %895 }
 0x520   :  { %v942_v29 = vsub.f32 %v1599_v13, %v912_v27  ;;  %v922_v31 = vmul.f32 0.6931472, %v1300_v4  ;;  %1313 = vlog2.f32 %v896_v28 }
 0x521   :  { %v1302_v32 = vpop.eup %1301  ;;  %v902_v34 = vpop.xlane.xlu0 %901 }
 0x522   :  { %958 = vst [vmem:[#allocation10 + $0x8] sm:$0xff] %v942_v29  ;;  %v947_v10 = vsub.f32 %v1602_v16, %v922_v31  ;;  %v924_v35 = vmul.f32 0.6931472, %v1302_v32  ;;  %1315 = vlog2.f32 %v902_v34 }
 0x523   :  { %v1304_v36 = vpop.eup %1303 }
 0x524   :  { %963 = vst [vmem:[#allocation10 + $0x30] sm:$0xff] %v947_v10  ;;  %v948_v7 = vsub.f32 %v1605_v46, %v924_v35  ;;  %v918_v38 = vmul.f32 0.6931472, %v1304_v36 }
 0x525   :  { %v1306_v39 = vpop.eup %1305  ;;  %v904_v40 = vpop.xlane.xlu1 %903 }
 0x526   :  { %964 = vst [vmem:[#allocation10 + $0x38] sm:$0xff] %v948_v7  ;;  %v945_v41 = vsub.f32 %v1608_v19, %v918_v38  ;;  %v920_v13 = vmul.f32 0.6931472, %v1306_v39  ;;  %1317 = vlog2.f32 %v904_v40  ;;  %v906_v42 = vpop.xlane.xlu0 %905 }
 0x527   :  { %v1308_v45 = vpop.eup %1307  ;;  %1319 = vlog2.f32 %v906_v42 }
 0x528   :  { %961 = vst [vmem:[#allocation10 + $0x20] sm:$0xff] %v945_v41  ;;  %v946_v16 = vsub.f32 %v1611_v51, %v920_v13  ;;  %v930_v53 = vmul.f32 0.6931472, %v1308_v45 }
 0x529   :  { %v1310_v54 = vpop.eup %1309  ;;  %v908_v55 = vpop.xlane.xlu1 %907 }
 0x52a   :  { %962 = vst [vmem:[#allocation10 + $0x28] sm:$0xff] %v946_v16  ;;  %v951_v46 = vsub.f32 %v1614_v22, %v930_v53  ;;  %v932_v56 = vmul.f32 0.6931472, %v1310_v54  ;;  %1321 = vlog2.f32 %v908_v55 }
 0x52b   :  { %v1312_v59 = vpop.eup %1311 }
 0x52c   :  { %967 = vst [vmem:[#allocation10 + $0x50] sm:$0xff] %v951_v46  ;;  %v952_v19 = vsub.f32 %v1617_v26, %v932_v56  ;;  %v926_v60 = vmul.f32 0.6931472, %v1312_v59 }
 0x52d   :  { %v1314_v61 = vpop.eup %1313 }
 0x52e   :  { %968 = vst [vmem:[#allocation10 + $0x58] sm:$0xff] %v952_v19  ;;  %v949_v62 = vsub.f32 %v1621_v30, %v926_v60  ;;  %v928_v63 = vmul.f32 0.6931472, %v1314_v61 }
 0x52f   :  { %v1316_v0 = vpop.eup %1315 }
 0x530   :  { %965 = vst [vmem:[#allocation10 + $0x40] sm:$0xff] %v949_v62  ;;  %v950_v51 = vsub.f32 %v1625_v33, %v928_v63  ;;  %v934_v1 = vmul.f32 0.6931472, %v1316_v0 }
 0x532   :  { %966 = vst [vmem:[#allocation10 + $0x48] sm:$0xff] %v950_v51  ;;  %v953_v22 = vsub.f32 %v1629_v37, %v934_v1 }
 0x533   :  { %v1318_v2 = vpop.eup %1317 }
 0x534   :  { %v1320_v3 = vpop.eup %1319  ;;  %969 = vst [vmem:[#allocation10 + $0x60] sm:$0xff] %v953_v22  ;;  %v936_v58 = vmul.f32 0.6931472, %v1318_v2 }
 0x535   :  { %v938_v5 = vmul.f32 0.6931472, %v1320_v3 }
 0x536   :  { %v954_v26 = vsub.f32 %v1633_v43, %v936_v58 }
 0x537   :  { %v1322_v6 = vpop.eup %1321  ;;  %v955_v8 = vsub.f32 %v1636_v44, %v938_v5 }
 0x538   :  { %970 = vst [vmem:[#allocation10 + $0x68] sm:$0xff] %v954_v26  ;;  %v940_v30 = vmul.f32 0.6931472, %v1322_v6 }
 0x539   :  { %971 = vst [vmem:[#allocation10 + $0x70] sm:$0xff] %v955_v8 }
 0x53a   :  { %v956_v33 = vsub.f32 %v1641_v57, %v940_v30 }
 0x53c   :  { %972 = vst [vmem:[#allocation10 + $0x78] sm:$0xff] %v956_v33 }
 0x53d   :  { %1414 = shalt.err (!%p1411_p10)
}
 0x53e   :  { %s1438_s20 = smov 128   ;;  %s1439_s21 = smov 8  }
 0x53f   :  { %984 = dma.vmem_to_hbm [thread:$0]  %s979_s18, 2048, %s1669_s6, [#allocation4], %s1438_s20, %s1438_s20, %s1439_s21  }
 0x540   :  { %1429 = dma.done.wait [#allocation4], 2048  }
 0x541   :  { %1430 = vsyncadd [#allocation4], 4294965248 }
 0x542   :  { %988 = vsyncpa [#allocation3], 1 }
 0x543   :  { %989 = vsyncpa [#allocation6], 1 }
 0x544   :  { %990 = vsyncpa [#allocation9], 1 }
 0x545   :  { %991 = vsyncpa [#allocation4], 1 }

</bundles_post_ra>
